<compile_context>
chip_gen: v7x
topology: tpu7x:2x2x1
jax: 0.10.0
libtpu: 0.0.40
codegen_flags: <defaults>
</compile_context>

<pallas_src>
import functools

import jax
import jax.numpy as jnp
from jax.experimental import pallas as pl
from jax.experimental.pallas import tpu as pltpu


def text_encoder_kernel(x_ref, mask_ref, cw_ref, cb_ref, v_ref, vb_ref, q_ref,
                        o_ref, *, seq_len, window, use_relu, batch_tile):
    """Processes `batch_tile` items per grid step.

    x_ref    : (TB, S + 2*pad, E)   bf16 zero-padded embeddings
    mask_ref : (TB, S, 1)           f32, 1.0 = keep, 0.0 = masked
    cw_ref   : (W, E, F_pad)        bf16 conv taps (torch (F,E,W) transposed, F padded to 128k)
    cb_ref   : (1, F_pad)           f32 conv bias
    v_ref    : (F_pad, Q) bf16, vb_ref : (1, Q) f32   fc1
    q_ref    : (1, Q)               f32 fc2 weight as a row (qb cancels in softmax)
    o_ref    : (TB, 1, F_pad)       f32 pooled output
    """
    tb, s = batch_tile, seq_len
    f_pad = cw_ref.shape[2]
    e = x_ref.shape[2]

    # Small slab (TB*S_pad*E bf16) -> fine to materialize fully at these sizes.
    x = x_ref[...]                                        # (TB, S_pad, E) bf16

    # --- Conv1d ('same', odd window) as W shifted matmuls on the MXU, M = TB*S ---
    conv = jnp.zeros((tb * s, f_pad), jnp.float32)
    for k in range(window):                               # static, small unrolled loop
        xs = x[:, k:k + s, :].reshape(tb * s, e)          # leading-dim merge only
        conv = conv + jnp.dot(xs, cw_ref[k], preferred_element_type=jnp.float32)
    conv = conv + cb_ref[...]                             # (TB*S, F_pad) f32
    if use_relu:
        conv = jnp.maximum(conv, 0.0)

    # --- AttentionPooling: a = q^T tanh(V k + v); softmax over seq; weighted sum ---
    h = jnp.tanh(jnp.dot(conv.astype(jnp.bfloat16), v_ref[...],
                         preferred_element_type=jnp.float32) + vb_ref[...])   # (TB*S, Q)
    # fc2 as VPU multiply + lane reduce instead of an N=1 MXU matmul.
    a = jnp.sum(h * q_ref[...], axis=-1, keepdims=True)                        # (TB*S, 1)

    a3 = a.reshape(tb, s, 1)                               # split leading dim only
    a3 = jnp.where(mask_ref[...] == 0.0, -1e9, a3)         # masked_fill semantics
    a3 = a3 - jnp.max(a3, axis=1, keepdims=True)           # stable softmax over seq
    p = jnp.exp(a3)
    alpha = p / jnp.sum(p, axis=1, keepdims=True)          # (TB, S, 1)

    conv3 = conv.reshape(tb, s, f_pad)                     # (TB, S, F_pad)
    o_ref[...] = jnp.sum(conv3 * alpha, axis=1, keepdims=True)   # (TB, 1, F_pad)


def text_encoder(tokens, mask, emb_table, cw, cb, V, vb, q, qb,
                 *, window, use_relu=False, batch_tile=8):
    """tokens (B,S) int, mask (B,S); returns (B, filter_num) f32."""
    assert window % 2 == 1, "torch Conv1d(padding=W//2) is 'same' only for odd windows"
    B, S = tokens.shape
    E = emb_table.shape[1]
    Fn = cw.shape[2]
    Q = V.shape[1]
    pad = window // 2
    S_pad = S + 2 * pad
    F_pad = ((Fn + 127) // 128) * 128                      # lane-dense filter axis

    # Batch tile: largest divisor of B that is <= batch_tile.
    # (On v7x keep B // tb >= 2 so both TensorCores get work.)
    tb = min(batch_tile, B)
    while B % tb:
        tb -= 1

    # Embedding gather + padding in bf16 (half the HBM traffic of f32).
    x_emb = emb_table.astype(jnp.bfloat16)[tokens]                     # (B, S, E)
    x_pad = jnp.pad(x_emb, ((0, 0), (pad, pad), (0, 0)))               # (B, S_pad, E)

    mask3 = mask.astype(jnp.float32)[..., None]                        # (B, S, 1)

    # Zero-pad the filter axis (inert through bias/relu/fc1), cast matmul weights to bf16.
    cw_p = jnp.pad(cw, ((0, 0), (0, 0), (0, F_pad - Fn))).astype(jnp.bfloat16)   # (W,E,F_pad)
    cb_p = jnp.pad(jnp.reshape(cb, (1, Fn)).astype(jnp.float32),
                   ((0, 0), (0, F_pad - Fn)))                                    # (1,F_pad)
    V_p = jnp.pad(V, ((0, F_pad - Fn), (0, 0))).astype(jnp.bfloat16)             # (F_pad,Q)
    vb_r = jnp.reshape(vb, (1, Q)).astype(jnp.float32)                           # (1,Q)
    q_row = jnp.reshape(q, (1, Q)).astype(jnp.float32)                           # (1,Q)
    del qb  # uniform shift of the scores: cancels exactly in the softmax

    kernel = functools.partial(text_encoder_kernel, seq_len=S, window=window,
                               use_relu=use_relu, batch_tile=tb)

    out = pl.pallas_call(
        kernel,
        out_shape=jax.ShapeDtypeStruct((B, 1, F_pad), jnp.float32),
        grid_spec=pltpu.PrefetchScalarGridSpec(
            num_scalar_prefetch=0,
            grid=(B // tb,),
            in_specs=[
                pl.BlockSpec((tb, S_pad, E), lambda b: (b, 0, 0)),       # embeddings
                pl.BlockSpec((tb, S, 1), lambda b: (b, 0, 0)),           # mask
                pl.BlockSpec((window, E, F_pad), lambda b: (0, 0, 0)),   # conv weight
                pl.BlockSpec((1, F_pad), lambda b: (0, 0)),              # conv bias
                pl.BlockSpec((F_pad, Q), lambda b: (0, 0)),              # fc1 weight
                pl.BlockSpec((1, Q), lambda b: (0, 0)),                  # fc1 bias
                pl.BlockSpec((1, Q), lambda b: (0, 0)),                  # fc2 weight row
            ],
            out_specs=pl.BlockSpec((tb, 1, F_pad), lambda b: (b, 0, 0)),
        ),
        compiler_params=pltpu.CompilerParams(
            dimension_semantics=("parallel",)),
    )(x_pad, mask3, cw_p, cb_p, V_p, vb_r, q_row)

    return out[:, 0, :Fn]


def text_encoder_reference(tokens, mask, emb_table, cw, cb, V, vb, q, qb,
                           *, window, use_relu=False):
    """Pure-JAX f32 reference mirroring the PyTorch forward (eval mode)."""
    pad = window // 2
    S = tokens.shape[1]
    x = emb_table[tokens].astype(jnp.float32)
    x = jnp.pad(x, ((0, 0), (pad, pad), (0, 0)))
    conv = jnp.zeros((tokens.shape[0], S, cw.shape[2]), jnp.float32)
    for k in range(window):
        conv = conv + jnp.einsum('bse,ef->bsf', x[:, k:k + S, :], cw[k])
    conv = conv + jnp.reshape(cb, (1, 1, -1))
    if use_relu:
        conv = jnp.maximum(conv, 0.0)
    h = jnp.tanh(jnp.einsum('bsf,fq->bsq', conv, V) + jnp.reshape(vb, (1, 1, -1)))
    a = jnp.einsum('bsq,qo->bso', h, q) + qb
    a = jnp.where(mask[..., None] == 0, -1e9, a)
    alpha = jax.nn.softmax(a, axis=-2)
    return jnp.einsum('bso,bsf->bf', alpha, conv)


if __name__ == "__main__":
    # Small shapes consistent with the module.
    B, S, E, Fn, W, Q = 2, 16, 32, 32, 3, 32
    VOCAB = 50
    use_relu = True

    key = jax.random.PRNGKey(0)
    k_emb, k_tok, k_cw, k_cb, k_v, k_vb, k_q, k_qb = jax.random.split(key, 8)

    emb_table = jax.random.normal(k_emb, (VOCAB, E), jnp.float32) * 0.1
    tokens = jax.random.randint(k_tok, (B, S), 0, VOCAB)
    cw = jax.random.normal(k_cw, (W, E, Fn), jnp.float32) * 0.1   # conv weight, taps-major
    cb = jax.random.normal(k_cb, (Fn,), jnp.float32) * 0.1
    V = jax.random.normal(k_v, (Fn, Q), jnp.float32) * 0.1        # fc1 weight (in, out)
    vb = jax.random.normal(k_vb, (Q,), jnp.float32) * 0.1
    q = jax.random.normal(k_q, (Q, 1), jnp.float32) * 0.1         # fc2 weight (in, out)
    qb = jax.random.normal(k_qb, (), jnp.float32) * 0.1
    # Mask: keep first tokens, mask out the tail of the second sequence.
    mask = (jnp.arange(S)[None, :] < jnp.array([[S], [S - 4]])).astype(jnp.int32)

    out = text_encoder(tokens, mask, emb_table, cw, cb, V, vb, q, qb,
                       window=W, use_relu=use_relu)
    out = jax.block_until_ready(out)

    ref = text_encoder_reference(tokens, mask, emb_table, cw, cb, V, vb, q, qb,
                                 window=W, use_relu=use_relu)
    ref = jax.block_until_ready(ref)

    assert out.shape == (B, Fn), out.shape
    max_diff = float(jnp.max(jnp.abs(out - ref)))
    # Loose tolerance vs the full-f32 reference because matmul operands are bf16 in the kernel.
    assert jnp.allclose(out, ref, atol=1e-2, rtol=1e-2), (max_diff, out, ref)
    print("KERNEL_OK")
</pallas_src>

<mosaic_0001>
module attributes {stable_mosaic.version = 11 : i64} {
  func.func @text_encoder_kernel(%arg0: i32, %arg1: memref<2x18x32xbf16, #tpu.memory_space<vmem>>, %arg2: memref<2x16x1xf32, #tpu.memory_space<vmem>>, %arg3: memref<3x32x128xbf16, #tpu.memory_space<vmem>>, %arg4: memref<1x128xf32, #tpu.memory_space<vmem>>, %arg5: memref<128x32xbf16, #tpu.memory_space<vmem>>, %arg6: memref<1x32xf32, #tpu.memory_space<vmem>>, %arg7: memref<1x32xf32, #tpu.memory_space<vmem>>, %arg8: memref<2x1x128xf32, #tpu.memory_space<vmem>>) attributes {dimension_semantics = [#tpu.dimension_semantics<parallel>], iteration_bounds = array<i64: 1>, scalar_prefetch = 0 : i64, scratch_operands = 0 : i64, tpu.core_type = #tpu.core_type<tc>, window_params = [{transform_indices = @transform_0, window_bounds = array<i64: 2, 18, 32>}, {transform_indices = @transform_1, window_bounds = array<i64: 2, 16, 1>}, {pipeline_mode = #tpu.pipeline_mode<synchronous>, transform_indices = @transform_2, window_bounds = array<i64: 3, 32, 128>}, {pipeline_mode = #tpu.pipeline_mode<synchronous>, transform_indices = @transform_3, window_bounds = array<i64: 1, 128>}, {pipeline_mode = #tpu.pipeline_mode<synchronous>, transform_indices = @transform_4, window_bounds = array<i64: 128, 32>}, {pipeline_mode = #tpu.pipeline_mode<synchronous>, transform_indices = @transform_5, window_bounds = array<i64: 1, 32>}, {pipeline_mode = #tpu.pipeline_mode<synchronous>, transform_indices = @transform_6, window_bounds = array<i64: 1, 32>}, {transform_indices = @transform_7, window_bounds = array<i64: 2, 1, 128>}]} {
    %c0 = arith.constant 0 : index
    %c0_0 = arith.constant 0 : index
    %c0_1 = arith.constant 0 : index
    %0 = vector.load %arg1[%c0, %c0_0, %c0_1] : memref<2x18x32xbf16, #tpu.memory_space<vmem>>, vector<2x18x32xbf16>
    %cst = arith.constant 0.000000e+00 : f32
    %1 = vector.broadcast %cst : f32 to vector<32x128xf32>
    %2 = vector.extract_strided_slice %0 {offsets = [0, 0, 0], sizes = [2, 16, 32], strides = [1, 1, 1]} : vector<2x18x32xbf16> to vector<2x16x32xbf16>
    %3 = vector.shape_cast %2 : vector<2x16x32xbf16> to vector<32x32xbf16>
    %c0_2 = arith.constant 0 : index
    %c0_3 = arith.constant 0 : index
    %c0_4 = arith.constant 0 : index
    %4 = vector.load %arg3[%c0_2, %c0_3, %c0_4] : memref<3x32x128xbf16, #tpu.memory_space<vmem>>, vector<1x32x128xbf16>
    %5 = vector.shape_cast %4 : vector<1x32x128xbf16> to vector<32x128xbf16>
    %cst_5 = arith.constant dense<0.000000e+00> : vector<32x128xf32>
    %6 = tpu.matmul %3, %5, %cst_5 {dimension_numbers = #tpu.dot_dimension_numbers<[1], [0], [0], [1], [0, 0, 1, 1], [], []>} : vector<32x32xbf16>, vector<32x128xbf16>, vector<32x128xf32> -> vector<32x128xf32>
    %7 = arith.addf %1, %6 : vector<32x128xf32>
    %8 = vector.extract_strided_slice %0 {offsets = [0, 1, 0], sizes = [2, 16, 32], strides = [1, 1, 1]} : vector<2x18x32xbf16> to vector<2x16x32xbf16>
    %9 = vector.shape_cast %8 : vector<2x16x32xbf16> to vector<32x32xbf16>
    %c1 = arith.constant 1 : index
    %c0_6 = arith.constant 0 : index
    %c0_7 = arith.constant 0 : index
    %10 = vector.load %arg3[%c1, %c0_6, %c0_7] : memref<3x32x128xbf16, #tpu.memory_space<vmem>>, vector<1x32x128xbf16>
    %11 = vector.shape_cast %10 : vector<1x32x128xbf16> to vector<32x128xbf16>
    %cst_8 = arith.constant dense<0.000000e+00> : vector<32x128xf32>
    %12 = tpu.matmul %9, %11, %cst_8 {dimension_numbers = #tpu.dot_dimension_numbers<[1], [0], [0], [1], [0, 0, 1, 1], [], []>} : vector<32x32xbf16>, vector<32x128xbf16>, vector<32x128xf32> -> vector<32x128xf32>
    %13 = arith.addf %7, %12 : vector<32x128xf32>
    %14 = vector.extract_strided_slice %0 {offsets = [0, 2, 0], sizes = [2, 16, 32], strides = [1, 1, 1]} : vector<2x18x32xbf16> to vector<2x16x32xbf16>
    %15 = vector.shape_cast %14 : vector<2x16x32xbf16> to vector<32x32xbf16>
    %c2 = arith.constant 2 : index
    %c0_9 = arith.constant 0 : index
    %c0_10 = arith.constant 0 : index
    %16 = vector.load %arg3[%c2, %c0_9, %c0_10] : memref<3x32x128xbf16, #tpu.memory_space<vmem>>, vector<1x32x128xbf16>
    %17 = vector.shape_cast %16 : vector<1x32x128xbf16> to vector<32x128xbf16>
    %cst_11 = arith.constant dense<0.000000e+00> : vector<32x128xf32>
    %18 = tpu.matmul %15, %17, %cst_11 {dimension_numbers = #tpu.dot_dimension_numbers<[1], [0], [0], [1], [0, 0, 1, 1], [], []>} : vector<32x32xbf16>, vector<32x128xbf16>, vector<32x128xf32> -> vector<32x128xf32>
    %19 = arith.addf %13, %18 : vector<32x128xf32>
    %c0_12 = arith.constant 0 : index
    %c0_13 = arith.constant 0 : index
    %20 = vector.load %arg4[%c0_12, %c0_13] : memref<1x128xf32, #tpu.memory_space<vmem>>, vector<1x128xf32>
    %21 = vector.broadcast %20 : vector<1x128xf32> to vector<32x128xf32>
    %22 = arith.addf %19, %21 : vector<32x128xf32>
    %cst_14 = arith.constant 0.000000e+00 : f32
    %23 = vector.broadcast %cst_14 : f32 to vector<32x128xf32>
    %24 = arith.maximumf %22, %23 : vector<32x128xf32>
    %25 = arith.truncf %24 : vector<32x128xf32> to vector<32x128xbf16>
    %c0_15 = arith.constant 0 : index
    %c0_16 = arith.constant 0 : index
    %26 = vector.load %arg5[%c0_15, %c0_16] : memref<128x32xbf16, #tpu.memory_space<vmem>>, vector<128x32xbf16>
    %cst_17 = arith.constant dense<0.000000e+00> : vector<32x32xf32>
    %27 = tpu.matmul %25, %26, %cst_17 {dimension_numbers = #tpu.dot_dimension_numbers<[1], [0], [0], [1], [0, 0, 1, 1], [], []>} : vector<32x128xbf16>, vector<128x32xbf16>, vector<32x32xf32> -> vector<32x32xf32>
    %c0_18 = arith.constant 0 : index
    %c0_19 = arith.constant 0 : index
    %28 = vector.load %arg6[%c0_18, %c0_19] : memref<1x32xf32, #tpu.memory_space<vmem>>, vector<1x32xf32>
    %29 = vector.broadcast %28 : vector<1x32xf32> to vector<32x32xf32>
    %30 = arith.addf %27, %29 : vector<32x32xf32>
    %31 = math.tanh %30 : vector<32x32xf32>
    %c0_20 = arith.constant 0 : index
    %c0_21 = arith.constant 0 : index
    %32 = vector.load %arg7[%c0_20, %c0_21] : memref<1x32xf32, #tpu.memory_space<vmem>>, vector<1x32xf32>
    %33 = vector.broadcast %32 : vector<1x32xf32> to vector<32x32xf32>
    %34 = arith.mulf %31, %33 : vector<32x32xf32>
    %cst_22 = arith.constant dense<0.000000e+00> : vector<32xf32>
    %35 = vector.multi_reduction <add>, %34, %cst_22 [1] : vector<32x32xf32> to vector<32xf32>
    %36 = vector.shape_cast %35 : vector<32xf32> to vector<32x1xf32>
    %37 = vector.shape_cast %36 : vector<32x1xf32> to vector<2x16x1xf32>
    %c0_23 = arith.constant 0 : index
    %c0_24 = arith.constant 0 : index
    %c0_25 = arith.constant 0 : index
    %38 = vector.load %arg2[%c0_23, %c0_24, %c0_25] : memref<2x16x1xf32, #tpu.memory_space<vmem>>, vector<2x16x1xf32>
    %cst_26 = arith.constant 0.000000e+00 : f32
    %39 = vector.broadcast %cst_26 : f32 to vector<2x16x1xf32>
    %40 = arith.cmpf oeq, %38, %39 : vector<2x16x1xf32>
    %cst_27 = arith.constant -1.000000e+09 : f32
    %41 = vector.broadcast %cst_27 : f32 to vector<2x16x1xf32>
    %42 = arith.select %40, %41, %37 : vector<2x16x1xi1>, vector<2x16x1xf32>
    %cst_28 = arith.constant dense<0xFF800000> : vector<2x1xf32>
    %43 = vector.multi_reduction <maximumf>, %42, %cst_28 [1] : vector<2x16x1xf32> to vector<2x1xf32>
    %44 = vector.shape_cast %43 : vector<2x1xf32> to vector<2x1x1xf32>
    %45 = vector.broadcast %44 : vector<2x1x1xf32> to vector<2x16x1xf32>
    %46 = arith.subf %42, %45 : vector<2x16x1xf32>
    %47 = math.exp %46 : vector<2x16x1xf32>
    %cst_29 = arith.constant dense<0.000000e+00> : vector<2x1xf32>
    %48 = vector.multi_reduction <add>, %47, %cst_29 [1] : vector<2x16x1xf32> to vector<2x1xf32>
    %49 = vector.shape_cast %48 : vector<2x1xf32> to vector<2x1x1xf32>
    %50 = vector.broadcast %49 : vector<2x1x1xf32> to vector<2x16x1xf32>
    %51 = arith.divf %47, %50 : vector<2x16x1xf32>
    %52 = vector.shape_cast %24 : vector<32x128xf32> to vector<2x16x128xf32>
    %53 = vector.broadcast %51 : vector<2x16x1xf32> to vector<2x16x128xf32>
    %54 = arith.mulf %52, %53 : vector<2x16x128xf32>
    %cst_30 = arith.constant dense<0.000000e+00> : vector<2x128xf32>
    %55 = vector.multi_reduction <add>, %54, %cst_30 [1] : vector<2x16x128xf32> to vector<2x128xf32>
    %56 = vector.shape_cast %55 : vector<2x128xf32> to vector<2x1x128xf32>
    %c0_31 = arith.constant 0 : index
    %c0_32 = arith.constant 0 : index
    %c0_33 = arith.constant 0 : index
    %57 = vector.load %arg8[%c0_31, %c0_32, %c0_33] : memref<2x1x128xf32, #tpu.memory_space<vmem>>, vector<2x1x128xf32>
    tpu.vector_store %arg8[%c0_31, %c0_32, %c0_33], %56 {strides = array<i32>} : memref<2x1x128xf32, #tpu.memory_space<vmem>>, vector<2x1x128xf32>,
    return
  }
  func.func @transform_0(%arg0: i32) -> (i32, i32, i32) {
    %c0_i32 = arith.constant 0 : i32
    %c0_i32_0 = arith.constant 0 : i32
    %c0_i32_1 = arith.constant 0 : i32
    return %arg0, %c0_i32, %c0_i32_0 : i32, i32, i32
  }
  func.func @transform_1(%arg0: i32) -> (i32, i32, i32) {
    %c0_i32 = arith.constant 0 : i32
    %c0_i32_0 = arith.constant 0 : i32
    %c0_i32_1 = arith.constant 0 : i32
    return %arg0, %c0_i32, %c0_i32_0 : i32, i32, i32
  }
  func.func @transform_2(%arg0: i32) -> (i32, i32, i32) {
    %c0_i32 = arith.constant 0 : i32
    %c0_i32_0 = arith.constant 0 : i32
    %c0_i32_1 = arith.constant 0 : i32
    %c0_i32_2 = arith.constant 0 : i32
    return %c0_i32, %c0_i32_0, %c0_i32_1 : i32, i32, i32
  }
  func.func @transform_3(%arg0: i32) -> (i32, i32) {
    %c0_i32 = arith.constant 0 : i32
    %c0_i32_0 = arith.constant 0 : i32
    %c0_i32_1 = arith.constant 0 : i32
    return %c0_i32, %c0_i32_0 : i32, i32
  }
  func.func @transform_4(%arg0: i32) -> (i32, i32) {
    %c0_i32 = arith.constant 0 : i32
    %c0_i32_0 = arith.constant 0 : i32
    %c0_i32_1 = arith.constant 0 : i32
    return %c0_i32, %c0_i32_0 : i32, i32
  }
  func.func @transform_5(%arg0: i32) -> (i32, i32) {
    %c0_i32 = arith.constant 0 : i32
    %c0_i32_0 = arith.constant 0 : i32
    %c0_i32_1 = arith.constant 0 : i32
    return %c0_i32, %c0_i32_0 : i32, i32
  }
  func.func @transform_6(%arg0: i32) -> (i32, i32) {
    %c0_i32 = arith.constant 0 : i32
    %c0_i32_0 = arith.constant 0 : i32
    %c0_i32_1 = arith.constant 0 : i32
    return %c0_i32, %c0_i32_0 : i32, i32
  }
  func.func @transform_7(%arg0: i32) -> (i32, i32, i32) {
    %c0_i32 = arith.constant 0 : i32
    %c0_i32_0 = arith.constant 0 : i32
    %c0_i32_1 = arith.constant 0 : i32
    return %arg0, %c0_i32, %c0_i32_0 : i32, i32, i32
  }
}

</mosaic_0001>

<bundles_post_ra>
// kernel: tpu_custom_call.1
= control target key start
LH: loop header
LB: loop body
LE: loop exit
PB: predicated region body
PF: predicated region fallthrough
CT: control target
= control target key end

     0   :  { %vm38_vm0 = vsmask.f32 3328  ;;  %vm39_vm1 = vsmask.f32 7440  ;;  %vm112_vm3 = vcmask 261120   ;;  %vm247_vm4 = vcmask 1042432   ;;  %s1054_s0 = inlined_call_operand.vmem [shape: bf16[2,18,32], index: 0, kind: input, shape index: {}]   ;;  %s1055_s1 = inlined_call_operand.vmem [shape: f32[2,16,1], index: 1, kind: input, shape index: {}]   ;;  %s1056_s2 = inlined_call_operand.vmem [shape: bf16[3,32,128], index: 2, kind: input, shape index: {}]   ;;  %s1057_s3 = inlined_call_operand.vmem [shape: f32[1,128], index: 3, kind: input, shape index: {}]   ;;  %s1058_s4 = inlined_call_operand.vmem [shape: bf16[128,32], index: 4, kind: input, shape index: {}]   ;;  %s1059_s5 = inlined_call_operand.vmem [shape: f32[1,32], index: 5, kind: input, shape index: {}]   ;;  %s1060_s6 = inlined_call_operand.vmem [shape: f32[1,32], index: 6, kind: input, shape index: {}]   ;;  %s1061_s7 = inlined_call_operand.hbm [shape: f32[2,1,128], index: 7, kind: output, shape index: {}]  }
   0x1   :  { %v752_v0 = vld [vmem:[%s1056_s2 + $0x10] sm:$0xff]   ;;  %v753_v1 = vld [vmem:[%s1056_s2 + $0x18] sm:$0xff]   ;;  %v865_v2 = vld [vmem:[%s1054_s0] sm:$0xf]  ;;  %vm248_vm5 = vcmask 1046532  }
   0x2   :  { %694 = vmatprep.subr.bf16.mxu0 %v752_v0  ;;  %v870_v3 = vld [vmem:[%s1054_s0 + $0x4] sm:$0xf]  ;;  %v875_v4 = vld [vmem:[%s1054_s0 + $0x8] sm:$0x1]  ;;  %v42_v5 = vshrl.u32 %v865_v2, 16  ;;  %v45_v6 = vshll.u32 %v865_v2, 16  ;;  %vm904_vm2 = vmor %vm38_vm0, %vm39_vm1 }
   0x3   :  { %695 = vmatpush3.bf16.msra.mxu0 %v752_v0  ;;  %v51_v7 = vshll.u32 %v870_v3, 16  ;;  %v55_v8 = vshrl.u32 %v870_v3, 16  ;;  %v61_v9 = vshll.u32 %v875_v4, 16  ;;  %v754_v12 = vld [vmem:[%s1056_s2] sm:$0xff]   ;;  %v888_v16 = vld [vmem:[%s1054_s0 + $0xc] sm:$0xf]  ;;  %v643_v46 = vcombine.low %v865_v2, %v870_v3 }
   0x4   :  { %696 = vmatprep.subr.bf16.mxu0 %v753_v1  ;;  %v44_v10 = vrot.slane %v42_v5, 4  ;;  %v47_v11 = vrot.slane %v45_v6, 5  ;;  %v893_v18 = vld [vmem:[%s1054_s0 + $0x10] sm:$0xf]  ;;  %v898_v19 = vld [vmem:[%s1054_s0 + $0x14] sm:$0x1] }
   0x5   :  { %v53_v13 = vrot.slane %v51_v7, 5  ;;  %v57_v14 = vrot.slane %v55_v8, 4  ;;  %v63_v15 = vrot.slane %v61_v9, 5  ;;  %v66_v20 = vshrl.u32 %v888_v16, 16  ;;  %v760_v40 = vld [vmem:[%s1058_s4] sm:$0xff]   ;;  %v761_v42 = vld [vmem:[%s1058_s4 + $0x8] sm:$0xff]  }
   0x6   :  { %v48_v17 = vor.u32 %v47_v11, %v44_v10  ;;  %v69_v21 = vshll.u32 %v888_v16, 16  ;;  %v75_v24 = vshll.u32 %v893_v18, 16  ;;  %v79_v25 = vshrl.u32 %v893_v18, 16  ;;  %718 = vmatprep.subr.bf16.mxu1 %v760_v40  ;;  %v755_v45 = vld [vmem:[%s1056_s2 + $0x8] sm:$0xff]   ;;  %v762_v49 = vld [vmem:[%s1058_s4 + $0x10] sm:$0xff]  }
   0x7   :  { %697 = vmatpush3.bf16.msra.mxu0 %v753_v1  ;;  %v58_v23 = vor.u32 %v57_v14, %v53_v13  ;;  %v85_v26 = vshll.u32 %v898_v19, 16  ;;  %v68_v28 = vrot.slane %v66_v20, 4  ;;  %v252_v47 = vrot.slane %v870_v3, 5  ;;  %719 = vmatpush3.bf16.msra.mxu1 %v760_v40 }
   0x8   :  { %702 = vmatprep.subr.bf16.mxu0 %v754_v12  ;;  %v49_v27 = vrot.slane %v48_v17, 4  ;;  %v71_v29 = vrot.slane %v69_v21, 5  ;;  %v77_v31 = vrot.slane %v75_v24, 5  ;;  %v81_v32 = vrot.slane %v79_v25, 4  ;;  %720 = vmatprep.subr.bf16.mxu1 %v761_v42 }
   0x9   :  { %v59_v30 = vrot.slane %v58_v23, 4  ;;  %v87_v37 = vrot.slane %v85_v26, 5 }
   0xa   :  { %v54_v33 = vsel %vm904_vm2, %v49_v27, %v53_v13  ;;  %v72_v34 = vor.u32 %v71_v29, %v68_v28  ;;  %v82_v36 = vor.u32 %v81_v32, %v77_v31 }
   0xb   :  { %v64_v35 = vsel %vm904_vm2, %v59_v30, %v63_v15 }
   0xc   :  { %v637_v38 = vcombine.low %v54_v33, %v64_v35  ;;  %v73_v39 = vrot.slane %v72_v34, 4  ;;  %v83_v41 = vrot.slane %v82_v36, 4 }
   0xe   :  { %698 = vmatprep.mubr.msk.bf16.mxu0 %vm112_vm3, %v637_v38  ;;  %v78_v43 = vsel %vm904_vm2, %v73_v39, %v77_v31  ;;  %v88_v44 = vsel %vm904_vm2, %v83_v41, %v87_v37 }
   0xf   :  { %v638_v48 = vcombine.low %v78_v43, %v88_v44 }
  0x11   :  { %699 = vmatmul.mubr.msk.bf16.vlgmr.msra.gmra.mrb[0].mxu0 %vm112_vm3, %v638_v48 }
  0x12   :  { %703 = vmatpush3.bf16.msra.mxu0 %v754_v12  ;;  %706 = vmatprep.mubr.msk.bf16.mxu0 %vm112_vm3, %v643_v46 }
  0x13   :  { %12 = vsyncpa [#allocation3], 0  ;;  %v255_v50 = vrot.slane %v875_v4, 5  ;;  %704 = vmatprep.subr.bf16.mxu0 %v755_v45  ;;  %v757_v51 = vld [vmem:[%s1056_s2 + $0x20] sm:$0xff]   ;;  %v649_v52 = vrot.slane %v865_v2, 9  ;;  %v254_v53 = vrot.slane %v252_v47, 4  ;;  %721 = vmatpush3.bf16.msra.mxu1 %v761_v42  ;;  %v644_v59 = vcombine.low %v888_v16, %v893_v18 }
  0x14   :  { %vm943_vm6 = vmor %vm247_vm4, %vm248_vm5  ;;  %722 = vmatprep.subr.bf16.mxu1 %v762_v49  ;;  %v763_v55 = vld [vmem:[%s1058_s4 + $0x18] sm:$0xff]   ;;  %v764_v58 = vld [vmem:[%s1058_s4 + $0x20] sm:$0xff]   ;;  %v259_v61 = vrot.slane %v893_v18, 5  ;;  %v262_v0 = vrot.slane %v898_v19, 5  ;;  %v650_v1 = vrot.slane %v888_v16, 9  ;;  %vm522_vm10 = vcmask 7168  }
  0x15   :  { %v253_v56 = vsel %vm943_vm6, %v649_v52, %v252_v47  ;;  %v256_v57 = vsel %vm943_vm6, %v254_v53, %v255_v50  ;;  %v759_v62 = vld [vmem:[%s1056_s2 + $0x28] sm:$0xff]   ;;  %v766_v6 = vld [vmem:[%s1058_s4 + $0x30] sm:$0xff]   ;;  %v767_v7 = vld [vmem:[%s1058_s4 + $0x38] sm:$0xff]  }
  0x16   :  { %705 = vmatpush3.bf16.msra.mxu0 %v755_v45  ;;  %v655_v60 = vcombine.low %v253_v56, %v256_v57  ;;  %v765_v63 = vld [vmem:[%s1058_s4 + $0x28] sm:$0xff]   ;;  %v261_v2 = vrot.slane %v259_v61, 4  ;;  %v260_v3 = vsel %vm943_vm6, %v650_v1, %v259_v61  ;;  %v661_v8 = vld [vmem:[%s1057_s3] ss:$0 sm:$0xff]  ;;  %v812_v45 = vmov 0   ;;  %v512_v46 = vld [vmem:[%s1055_s1 + $0x10] sm:$0xff] }
  0x17   :  { %710 = vmatprep.subr.bf16.mxu0 %v757_v51  ;;  %723 = vmatpush3.bf16.msra.mxu1 %v762_v49  ;;  %v662_v23 = vld [vmem:[%s1059_s5] ss:$0 sm:$0xff]  ;;  %v513_v48 = vld [vmem:[%s1055_s1 + $0x18] sm:$0xff]  ;;  %vm516_vm7 = vcmp.eq.f32.partialorder %v512_v46, 0.0  ;;  %v511_v50 = vld [vmem:[%s1055_s1 + $0x8] sm:$0xff] }
  0x18   :  { %724 = vmatprep.subr.bf16.mxu1 %v763_v55  ;;  %v263_v4 = vsel %vm943_vm6, %v261_v2, %v262_v0  ;;  %v671_v32 = vld [vmem:[%s1060_s6] ss:$0 sm:$0xff]  ;;  %751 = vset.pattern.permute.xlu1 %v812_v45  ;;  %vm517_vm9 = vcmp.eq.f32.partialorder %v513_v48, 0.0  ;;  %vm515_vm11 = vcmp.eq.f32.partialorder %v511_v50, 0.0 }
  0x19   :  { %v656_v5 = vcombine.low %v260_v3, %v263_v4  ;;  %750 = vset.pattern.permute.xlu0 %v812_v45  ;;  %v510_v47 = vld [vmem:[%s1055_s1] sm:$0xff]  ;;  %s813_s1 = smov [#allocation2]  }
  0x1a   :  { %vm514_vm8 = vcmp.eq.f32.partialorder %v510_v47, 0.0  ;;  %s622_s25 = sshll.u32 %s813_s1, 4  ;;  %s623_s25 = int_to_ptr.vmem [resolvable:$true] %s622_s25 }
  0x1b   :  { %725 = vmatpush3.bf16.msra.mxu1 %v763_v55  ;;  %s788_s26 = scalar_lea.vmem %s623_s25, 32  ;;  %p793_p1 = scmp.lt.s32.totalorder %s623_s25, %s623_s25 }
  0x1c   :  { %726 = vmatprep.subr.bf16.mxu1 %v764_v58  ;;  %p789_p0 = scmp.ne.s32.totalorder %s623_s25, %s788_s26  ;;  %p794_p2 = scmp.lt.s32.totalorder %s788_s26, %s788_s26 }
  0x1d   :  { %707 = vmatmul.mubr.msk.bf16.vlgmr.msra.gmra.mrb[0].mxu0 %vm112_vm3, %v644_v59 }
  0x1e   :  { %711 = vmatpush3.bf16.msra.mxu0 %v757_v51  ;;  %714 = vmatprep.mubr.msk.bf16.mxu0 %vm112_vm3, %v655_v60  ;;  %p795_p3 = por %p794_p2, %p793_p1 }
  0x1f   :  { %712 = vmatprep.subr.bf16.mxu0 %v759_v62  ;;  %727 = vmatpush3.bf16.msra.mxu1 %v764_v58 }
  0x20   :  { %728 = vmatprep.subr.bf16.mxu1 %v765_v63  ;;  %p796_p4 = pnand %p795_p3, %p789_p0 }
  0x22   :  { %713 = vmatpush3.bf16.msra.mxu0 %v759_v62 }
  0x23   :  { %729 = vmatpush3.bf16.msra.mxu1 %v765_v63 }
  0x24   :  { %730 = vmatprep.subr.bf16.mxu1 %v766_v6 }
  0x27   :  { %731 = vmatpush3.bf16.msra.mxu1 %v766_v6 }
  0x28   :  { %732 = vmatprep.subr.bf16.mxu1 %v767_v7 }
  0x29   :  { %715 = vmatmul.mubr.msk.bf16.vlgmr.msra.gmra.mrb[0].mxu0 %vm112_vm3, %v656_v5 }
  0x2b   :  { %733 = vmatpush3.bf16.msra.mxu1 %v767_v7 }
  0xfc   :  { %v716_v9 = vpop.f32.mrb[0].mxu0 }
  0xfd   :  { %v327_v10 = vpop.f32.mrb[1].mxu0  ;;  %v986_v13 = vadd.f32 %v716_v9, %v661_v8 }
  0xfe   :  { %v984_v11 = vadd.f32 %v661_v8, %v327_v10  ;;  %v717_v12 = vpop.f32.mrb[2].mxu0 }
  0xff   :  { %v988_v14 = vadd.f32 %v717_v12, %v661_v8  ;;  %v330_v15 = vpop.f32.mrb[3].mxu0  ;;  %v359_v20 = vmax.f32 %v986_v13, 0.0 }
 0x100   :  { %v990_v16 = vadd.f32 %v661_v8, %v330_v15  ;;  %v357_v18 = vmax.f32 %v984_v11, 0.0 }
 0x101   :  { %v360_v17 = vmax.f32 %v988_v14, 0.0 }
 0x102   :  { %v358_v19 = vmax.f32 %v990_v16, 0.0 }
 0x103   :  { %v362_v22 = vpack.c.bf16 %v360_v17, %v359_v20 }
 0x104   :  { %v361_v21 = vpack.c.bf16 %v358_v19, %v357_v18 }
 0x106   :  { %734 = vmatprep.mubr.bf16.mxu1 %v361_v21 }
 0x107   :  { %735 = vmatmul.mubr.bf16.vlgmr.msra.gmra.mrb[0].mxu1 %v362_v22 }
 0x1da   :  { %v736_v24 = vpop.f32.mrb[0].mxu1 }
 0x1db   :  { %v477_v25 = vadd.f32 %v736_v24, %v662_v23  ;;  %v468_v26 = vpop.f32.mrb[1].mxu1 }
 0x1dc   :  { %v469_v27 = vadd.f32 %v662_v23, %v468_v26  ;;  %v737_v28 = vpop.f32.mrb[2].mxu1 }
 0x1dd   :  { %768 = vtanh.f32 %v477_v25  ;;  %v480_v29 = vadd.f32 %v737_v28, %v662_v23  ;;  %v471_v30 = vpop.f32.mrb[3].mxu1 }
 0x1de   :  { %770 = vtanh.f32 %v469_v27  ;;  %v472_v31 = vadd.f32 %v662_v23, %v471_v30 }
 0x1df   :  { %772 = vtanh.f32 %v480_v29 }
 0x1e0   :  { %774 = vtanh.f32 %v472_v31 }
 0x1e7   :  { %v769_v33 = vpop.eup %768 }
 0x1e8   :  { %v771_v34 = vpop.eup %770  ;;  %v496_v35 = vmul.f32 %v769_v33, %v671_v32 }
 0x1e9   :  { %v773_v36 = vpop.eup %772  ;;  %v494_v37 = vmul.f32 %v771_v34, %v671_v32 }
 0x1ea   :  { %v775_v38 = vpop.eup %774  ;;  %v504_v39 = vsel %vm112_vm3, %v496_v35, 0.0  ;;  %v497_v40 = vmul.f32 %v773_v36, %v671_v32 }
 0x1eb   :  { %505 = vadd.xlane.f32.xlu1 %v504_v39  ;;  %v498_v41 = vsel %vm112_vm3, %v494_v37, 0.0  ;;  %v495_v42 = vmul.f32 %v775_v38, %v671_v32 }
 0x1ec   :  { %499 = vadd.xlane.f32.xlu0 %v498_v41  ;;  %v507_v43 = vsel %vm112_vm3, %v497_v40, 0.0 }
 0x1ed   :  { %v501_v44 = vsel %vm112_vm3, %v495_v42, 0.0 }
 0x1ef   :  { %508 = vadd.xlane.f32.xlu1 %v507_v43 }
 0x1f0   :  { %502 = vadd.xlane.f32.xlu0 %v501_v44 }
 0x278   :  { %v506_v49 = vpop.xlane.xlu1 %505 }
 0x279   :  { %v500_v51 = vpop.xlane.xlu0 %499  ;;  %v520_v52 = vsel %vm516_vm7, -1e+09, %v506_v49 }
 0x27a   :  { %v518_v53 = vsel %vm514_vm8, -1e+09, %v500_v51  ;;  %v532_v57 = vsel %vm522_vm10, %v520_v52, -inf }
 0x27b   :  { %v523_v60 = vsel %vm522_vm10, %v518_v53, -inf }
 0x27c   :  { %v509_v54 = vpop.xlane.xlu1 %508 }
 0x27d   :  { %v521_v55 = vsel %vm517_vm9, -1e+09, %v509_v54  ;;  %v503_v56 = vpop.xlane.xlu0 %502 }
 0x27e   :  { %v533_v58 = vsel %vm522_vm10, %v521_v55, -inf  ;;  %v519_v59 = vsel %vm515_vm11, -1e+09, %v503_v56 }
 0x27f   :  { %v534_v61 = vmax.f32 %v532_v57, %v533_v58  ;;  %v524_v62 = vsel %vm522_vm10, %v519_v59, -inf }
 0x280   :  { %v525_v63 = vmax.f32 %v523_v60, %v524_v62 }
 0x281   :  { %v535_v0 = vrot.slane %v534_v61, 4 }
 0x282   :  { %v526_v1 = vrot.slane %v525_v63, 4 }
 0x283   :  { %v536_v2 = vmax.f32 %v534_v61, %v535_v0 }
 0x284   :  { %v527_v3 = vmax.f32 %v525_v63, %v526_v1 }
 0x285   :  { %v537_v4 = vrot.slane %v536_v2, 2 }
 0x286   :  { %v528_v5 = vrot.slane %v527_v3, 2 }
 0x287   :  { %v538_v6 = vmax.f32 %v536_v2, %v537_v4 }
 0x288   :  { %v529_v7 = vmax.f32 %v527_v3, %v528_v5 }
 0x289   :  { %v539_v8 = vrot.slane %v538_v6, 1 }
 0x28a   :  { %v530_v9 = vrot.slane %v529_v7, 1 }
 0x28b   :  { %v540_v10 = vmax.f32 %v538_v6, %v539_v8 }
 0x28c   :  { %v531_v12 = vmax.f32 %v529_v7, %v530_v9 }
 0x28d   :  { %v543_v15 = vsub.f32 %v520_v52, %v540_v10  ;;  %v544_v21 = vsub.f32 %v521_v55, %v540_v10 }
 0x28e   :  { %v541_v22 = vsub.f32 %v518_v53, %v531_v12  ;;  %v542_v23 = vsub.f32 %v519_v59, %v531_v12 }
 0x28f   :  { %v549_v24 = vmul.f32 1.442695, %v543_v15  ;;  %v551_v25 = vmul.f32 1.442695, %v544_v21 }
 0x290   :  { %v545_v26 = vmul.f32 1.442695, %v541_v22  ;;  %v547_v27 = vmul.f32 1.442695, %v542_v23 }
 0x291   :  { %776 = vpow2.f32 %v549_v24 }
 0x292   :  { %778 = vpow2.f32 %v551_v25 }
 0x293   :  { %780 = vpow2.f32 %v545_v26 }
 0x294   :  { %782 = vpow2.f32 %v547_v27 }
 0x29b   :  { %v777_v28 = vpop.eup %776 }
 0x29c   :  { %v779_v29 = vpop.eup %778  ;;  %v562_v30 = vsel %vm522_vm10, %v777_v28, 0.0 }
 0x29d   :  { %v781_v31 = vpop.eup %780  ;;  %v563_v32 = vsel %vm522_vm10, %v779_v29, 0.0 }
 0x29e   :  { %v783_v33 = vpop.eup %782  ;;  %v564_v34 = vadd.f32 %v563_v32, %v562_v30  ;;  %v553_v35 = vsel %vm522_vm10, %v781_v31, 0.0 }
 0x29f   :  { %v554_v36 = vsel %vm522_vm10, %v783_v33, 0.0 }
 0x2a0   :  { %v565_v37 = vrot.slane %v564_v34, 4  ;;  %v555_v38 = vadd.f32 %v554_v36, %v553_v35 }
 0x2a2   :  { %v566_v39 = vadd.f32 %v565_v37, %v564_v34  ;;  %v556_v40 = vrot.slane %v555_v38, 4 }
 0x2a4   :  { %v567_v41 = vrot.slane %v566_v39, 2  ;;  %v557_v42 = vadd.f32 %v556_v40, %v555_v38 }
 0x2a6   :  { %v558_v43 = vrot.slane %v557_v42, 2  ;;  %v568_v44 = vadd.f32 %v567_v41, %v566_v39 }
 0x2a8   :  { %v569_v45 = vrot.slane %v568_v44, 1  ;;  %v559_v46 = vadd.f32 %v558_v43, %v557_v42 }
 0x2aa   :  { %v570_v47 = vadd.f32 %v569_v45, %v568_v44  ;;  %v560_v48 = vrot.slane %v559_v46, 1 }
 0x2ac   :  { %784 = vrcp.f32 %v570_v47  ;;  %v561_v49 = vadd.f32 %v560_v48, %v559_v46 }
 0x2ae   :  { %786 = vrcp.f32 %v561_v49 }
 0x2b6   :  { %v785_v50 = vpop.eup %784 }
 0x2b7   :  { %v575_v51 = vmul.f32 %v785_v50, %v777_v28  ;;  %v576_v55 = vmul.f32 %v785_v50, %v779_v29 }
 0x2b8   :  { %v787_v52 = vpop.eup %786 }
 0x2b9   :  { %589 = vperm.xlu1 %751, %v575_v51   ;;  %v572_v53 = vmul.f32 %v787_v52, %v781_v31  ;;  %v573_v54 = vmul.f32 %v787_v52, %v783_v33 }
 0x2bb   :  { %579 = vperm.xlu0 %750, %v572_v53  }
 0x2bd   :  { %584 = vperm.xlu1 %751, %v573_v54  }
 0x2c1   :  { %594 = vperm.xlu1 %751, %v576_v55  }
 0x338   :  { %v590_v56 = vpop.permute.xlu1 %589 }
 0x339   :  { %v599_v63 = vmul.f32 %v590_v56, %v359_v20 }
 0x33a   :  { %v580_v57 = vpop.permute.xlu0 %579 }
 0x33b   :  { %v597_v59 = vmul.f32 %v580_v57, %v357_v18 }
 0x33c   :  { %v585_v58 = vpop.permute.xlu1 %584 }
 0x33d   :  { %v598_v60 = vmul.f32 %v585_v58, %v358_v19 }
 0x33f   :  { %v601_v61 = vadd.f32 %v598_v60, %v597_v59 }
 0x340   :  { %v595_v62 = vpop.permute.xlu1 %594 }
 0x341   :  { %v602_v0 = vrot.slane %v601_v61, 4  ;;  %v600_v1 = vmul.f32 %v595_v62, %v360_v17 }
 0x343   :  { %v603_v2 = vadd.f32 %v602_v0, %v601_v61  ;;  %v608_v3 = vadd.f32 %v600_v1, %v599_v63 }
 0x345   :  { %v604_v4 = vrot.slane %v603_v2, 2  ;;  %v609_v5 = vrot.slane %v608_v3, 4 }
 0x347   :  { %v605_v6 = vadd.f32 %v604_v4, %v603_v2  ;;  %v610_v7 = vadd.f32 %v609_v5, %v608_v3 }
 0x349   :  { %v606_v11 = vrot.slane %v605_v6, 1  ;;  %v611_v18 = vrot.slane %v610_v7, 2 }
 0x34b   :  { %v607_v8 = vadd.f32 %v606_v11, %v605_v6  ;;  %v612_v16 = vadd.f32 %v611_v18, %v610_v7 }
 0x34d   :  { %615 = vst [vmem:[#allocation2] sm:$0x1] %v607_v8  ;;  %v613_v19 = vrot.slane %v612_v16, 1 }
 0x34f   :  { %v614_v13 = vadd.f32 %v613_v19, %v612_v16 }
 0x351   :  { %616 = vst [vmem:[#allocation2 + $0x1] sm:$0x1] %v614_v13 }
 0x352   :  { %799 = shalt.err (!%p796_p4)
}
 0x353   :  { %s800_s29 = scalar_lea.hbm %s1061_s7, 32 }
 0x354   :  { %p801_p5 = scmp.ne.s32.totalorder %s1061_s7, %s800_s29  ;;  %p804_p6 = scmp.lt.u32.totalorder %s800_s29, %s1061_s7 }
 0x356   :  { %p806_p7 = pnand %p804_p6, %p801_p5 }
 0x358   :  { %809 = shalt.err (!%p806_p7)
}
 0x359   :  { %s814_s11 = smov 16   ;;  %s815_s12 = smov 1  }
 0x35a   :  { %628 = dma.vmem_to_hbm [thread:$0]  %s623_s25, 32, %s1061_s7, [#allocation3], %s814_s11, %s814_s11, %s815_s12  }
 0x35b   :  { %810 = dma.done.wait [#allocation3], 32  }
 0x35c   :  { %811 = vsyncadd [#allocation3], 4294967264 }
 0x35d   :  { %632 = vsyncpa [#allocation3], 1 }

</bundles_post_ra>
